<compile_context>
chip_gen: v7x
topology: tpu7x:2x2x1
jax: 0.10.0
libtpu: 0.0.40
codegen_flags: <defaults>
</compile_context>

<pallas_src>
import math
import functools

import jax
import jax.numpy as jnp
from jax import lax
from jax.experimental import pallas as pl
from jax.experimental.pallas import tpu as pltpu


def _vmem_limit(block_bytes):
    """Generation-aware VMEM budget: ~75% of physical capacity, floor 32 MiB."""
    try:
        cap = int(pltpu.get_tpu_info().vmem_capacity_bytes)
    except Exception:
        cap = 64 << 20                      # conservative (v7x-sized) fallback
    ceiling = (cap * 3) // 4                # headroom for Mosaic internal scratch
    want = 2 * int(block_bytes) + (4 << 20)  # double buffering + slack
    return int(min(max(want, 32 << 20), ceiling))


def _supports_bf16_eup():
    """bf16 transcendentals are native on v6e/v7x; keep f32 exp elsewhere."""
    try:
        kind = jax.devices()[0].device_kind.lower()
    except Exception:
        return False
    return ("v6" in kind) or ("v7" in kind)


# ----------------------------------------------------------------------------
# Kernel 1: fused Q/K/V linear projection  (y = x @ W_qkv_t + b_qkv, one matmul)
# ----------------------------------------------------------------------------
def _qkv_linear_kernel(x_ref, wqkv_ref, bqkv_ref, q_ref, k_ref, v_ref, *,
                       hidden, q_scale):
    x = x_ref[...].astype(jnp.bfloat16)                   # no-op if already bf16
    y = jnp.dot(x, wqkv_ref[...],
                preferred_element_type=jnp.float32) + bqkv_ref[...]   # [tm, 3H] f32
    H = hidden
    # Fold the 1/sqrt(head_dim) attention scale into q in f32, before the cast.
    q_ref[...] = (y[:, 0 * H:1 * H] * q_scale).astype(q_ref.dtype)
    k_ref[...] = y[:, 1 * H:2 * H].astype(k_ref.dtype)
    v_ref[...] = y[:, 2 * H:3 * H].astype(v_ref.dtype)


def qkv_projection(x2d, wqkv_t, bqkv, *, q_scale, out_dtype=jnp.bfloat16,
                   tm_max=1024):
    N, H = x2d.shape
    H3 = wqkv_t.shape[1]
    tm = min(tm_max, N)
    grid = (pl.cdiv(N, tm),)

    out_sd = jax.ShapeDtypeStruct((N, H), out_dtype)
    out_itemsize = jnp.dtype(out_dtype).itemsize
    block_bytes = (tm * H * x2d.dtype.itemsize
                   + H * H3 * wqkv_t.dtype.itemsize
                   + H3 * 4
                   + 3 * tm * H * out_itemsize)
    bytes_accessed = (N * H * x2d.dtype.itemsize
                      + H * H3 * wqkv_t.dtype.itemsize
                      + H3 * 4
                      + 3 * N * H * out_itemsize)

    kern = functools.partial(_qkv_linear_kernel, hidden=H, q_scale=q_scale)

    def build(single_buffer_resident):
        if single_buffer_resident:
            # Constant index_map across the grid -> one buffer is enough.
            w_spec = pl.BlockSpec((H, H3), lambda i: (0, 0),
                                  pipeline_mode=pl.Buffered(1))
            b_spec = pl.BlockSpec((1, H3), lambda i: (0, 0),
                                  pipeline_mode=pl.Buffered(1))
        else:
            w_spec = pl.BlockSpec((H, H3), lambda i: (0, 0))
            b_spec = pl.BlockSpec((1, H3), lambda i: (0, 0))
        return pl.pallas_call(
            kern,
            out_shape=(out_sd, out_sd, out_sd),
            grid=grid,
            in_specs=[pl.BlockSpec((tm, H), lambda i: (i, 0)), w_spec, b_spec],
            out_specs=(pl.BlockSpec((tm, H), lambda i: (i, 0)),
                       pl.BlockSpec((tm, H), lambda i: (i, 0)),
                       pl.BlockSpec((tm, H), lambda i: (i, 0))),
            compiler_params=pltpu.CompilerParams(
                dimension_semantics=("parallel",),
                vmem_limit_bytes=_vmem_limit(block_bytes)),
            cost_estimate=pl.CostEstimate(
                flops=2 * N * H * H3,
                transcendentals=0,
                bytes_accessed=int(bytes_accessed)),
        )

    try:
        return build(True)(x2d, wqkv_t, bqkv)
    except Exception:
        # Fallback if this JAX build rejects single-buffered resident specs.
        return build(False)(x2d, wqkv_t, bqkv)


# ----------------------------------------------------------------------------
# Kernel 2: attention over all heads, tiled over (batch, query-row tiles)
#   q is already scaled by 1/sqrt(head_dim) in the projection kernel.
# ----------------------------------------------------------------------------
def _attention_kernel(q_ref, k_ref, v_ref, mask_ref, ctx_ref, *probs_refs,
                      num_heads, head_dim, exp_bf16):
    probs_ref = probs_refs[0] if probs_refs else None

    q_all = q_ref[0]                                  # [tq, H] bf16
    k_all = k_ref[0]                                  # [S,  H] bf16
    v_all = v_ref[0]                                  # [S,  H] bf16
    mask = mask_ref[0].astype(jnp.float32)            # [1,  S] additive mask

    # Contract last dim of q against last dim of k -> no in-kernel transpose.
    dn = (((1,), (1,)), ((), ()))

    for h in range(num_heads):                        # static unroll over heads
        lo = h * head_dim
        qh = q_all[:, lo:lo + head_dim]               # [tq, Dh]
        kh = k_all[:, lo:lo + head_dim]               # [S,  Dh]
        vh = v_all[:, lo:lo + head_dim]               # [S,  Dh]

        scores = lax.dot_general(qh, kh, dimension_numbers=dn,
                                 preferred_element_type=jnp.float32)  # [tq, S]
        scores = scores + mask                        # broadcast over rows

        m = jnp.max(scores, axis=-1, keepdims=True)
        xs = scores - m
        # bf16 exp on v6e/v7x (native bf16 EUP); f32 elsewhere.
        p = jnp.exp(xs.astype(jnp.bfloat16)) if exp_bf16 else jnp.exp(xs)
        l = jnp.sum(p.astype(jnp.float32), axis=-1, keepdims=True)
        # Exact reciprocal when probs are part of the output (rows sum to 1);
        # EUP approx reciprocal otherwise.
        inv_l = pl.reciprocal(l, approx=(probs_ref is None))

        # Un-normalized P@V on the MXU; normalize the small [tq, Dh] result.
        ctx_h = jnp.dot(p.astype(v_all.dtype), vh,
                        preferred_element_type=jnp.float32)            # [tq, Dh]
        # Per-head write-through (no concat): frees registers every iteration.
        ctx_ref[0, :, lo:lo + head_dim] = (ctx_h * inv_l).astype(ctx_ref.dtype)

        # TODO(synk): training-mode dropout / head_mask scaling not implemented.
        if probs_ref is not None:
            probs_ref[0, h] = (p.astype(jnp.float32) * inv_l).astype(probs_ref.dtype)


def attention_core(q, k, v, mask, num_heads, head_dim, output_attentions,
                   out_dtype=jnp.float32, probs_dtype=jnp.bfloat16, tq_max=256):
    # q, k, v: [B, S, H] (bf16); mask: [B, 1, S] additive (f32)
    B, S, H = q.shape
    tq = min(tq_max, S)
    grid = (B, pl.cdiv(S, tq))

    in_specs = [
        pl.BlockSpec((1, tq, H), lambda b, qi: (b, qi, 0)),   # q: query-row tiles
        pl.BlockSpec((1, S, H), lambda b, qi: (b, 0, 0)),     # k: fetched once / batch
        pl.BlockSpec((1, S, H), lambda b, qi: (b, 0, 0)),     # v: fetched once / batch
        pl.BlockSpec((1, 1, S), lambda b, qi: (b, 0, 0)),     # additive mask
    ]
    ctx_sd = jax.ShapeDtypeStruct((B, S, H), out_dtype)
    ctx_spec = pl.BlockSpec((1, tq, H), lambda b, qi: (b, qi, 0))

    out_itemsize = jnp.dtype(out_dtype).itemsize
    block_bytes = (tq * H * q.dtype.itemsize          # q tile
                   + 2 * S * H * q.dtype.itemsize     # k/v blocks
                   + S * 4                            # mask
                   + tq * H * out_itemsize            # ctx tile
                   + 3 * tq * S * 4)                  # per-head f32 intermediates
    bytes_accessed = (3 * B * S * H * q.dtype.itemsize
                      + B * S * 4
                      + B * S * H * out_itemsize)
    flops = 4 * B * num_heads * S * S * head_dim
    trans = B * num_heads * S * S

    if output_attentions:
        probs_itemsize = jnp.dtype(probs_dtype).itemsize
        out_shape = (ctx_sd,
                     jax.ShapeDtypeStruct((B, num_heads, S, S), probs_dtype))
        out_specs = (ctx_spec,
                     pl.BlockSpec((1, num_heads, tq, S),
                                  lambda b, qi: (b, 0, qi, 0)))
        block_bytes += num_heads * tq * S * probs_itemsize
        bytes_accessed += B * num_heads * S * S * probs_itemsize
    else:
        out_shape = ctx_sd
        out_specs = ctx_spec

    kern = functools.partial(_attention_kernel, num_heads=num_heads,
                             head_dim=head_dim, exp_bf16=_supports_bf16_eup())
    return pl.pallas_call(
        kern,
        out_shape=out_shape,
        grid=grid,
        in_specs=in_specs,
        out_specs=out_specs,
        compiler_params=pltpu.CompilerParams(
            dimension_semantics=("parallel", "parallel"),
            vmem_limit_bytes=_vmem_limit(block_bytes)),
        cost_estimate=pl.CostEstimate(
            flops=int(flops),
            transcendentals=int(trans),
            bytes_accessed=int(bytes_accessed)),
    )(q, k, v, mask)


# ----------------------------------------------------------------------------
# Wrapper reproducing BertSelfAttention.forward (self-attention path)
# ----------------------------------------------------------------------------
def bert_self_attention(params, prefix, hidden_states, attention_mask,
                        num_heads, output_attentions=True):
    B, S, H = hidden_states.shape
    assert H % num_heads == 0
    Dh = H // num_heads
    scale = 1.0 / math.sqrt(Dh)

    # Fused [H, 3H] bf16 weight slab ([in, out] layout -> no in-kernel .T) and
    # [1, 3H] f32 bias, built once in the wrapper.
    wqkv_t = jnp.concatenate(
        [params[f'{prefix}_query_weight'].T,
         params[f'{prefix}_key_weight'].T,
         params[f'{prefix}_value_weight'].T], axis=1).astype(jnp.bfloat16)
    bqkv = jnp.concatenate(
        [params[f'{prefix}_query_bias'],
         params[f'{prefix}_key_bias'],
         params[f'{prefix}_value_bias']]).astype(jnp.float32).reshape(1, 3 * H)

    # Keep activations bf16 end-to-end (halves kernel-1 HBM reads; this cast is
    # a no-op in a bf16 model).
    x2d = hidden_states.astype(jnp.bfloat16).reshape(B * S, H)
    q2d, k2d, v2d = qkv_projection(x2d, wqkv_t, bqkv, q_scale=scale)

    # Head split/merge happens inside the attention kernel (no
    # transpose_for_scores HBM round-trips in the wrapper).
    q = q2d.reshape(B, S, H)
    k = k2d.reshape(B, S, H)
    v = v2d.reshape(B, S, H)

    if attention_mask is None:
        mask = jnp.zeros((B, 1, S), jnp.float32)
    else:
        # Only padding-style masks that broadcast over query rows are supported.
        assert int(attention_mask.size) == B * S, (
            "per-query-row attention masks (e.g. causal [B,1,S,S]) not supported")
        # TODO(synk): per-query-row masks (causal / [B,1,S,S]) not implemented.
        mask = attention_mask.reshape(B, 1, S).astype(jnp.float32)

    out = attention_core(q, k, v, mask, num_heads, Dh, output_attentions,
                         out_dtype=hidden_states.dtype)
    if output_attentions:
        context_layer, attention_probs = out          # [B,S,H], [B,nH,S,S] bf16
        return context_layer, attention_probs
    return (out,)


# ----------------------------------------------------------------------------
# Example run
# ----------------------------------------------------------------------------
if __name__ == "__main__":
    B, S, H, nH = 2, 8, 32, 4   # hidden=32, 4 heads -> head_dim=8

    key = jax.random.PRNGKey(0)
    ks = jax.random.split(key, 8)

    prefix = "layer0"
    params = {
        f'{prefix}_query_weight': jax.random.normal(ks[0], (H, H), jnp.float32) * 0.05,
        f'{prefix}_key_weight':   jax.random.normal(ks[1], (H, H), jnp.float32) * 0.05,
        f'{prefix}_value_weight': jax.random.normal(ks[2], (H, H), jnp.float32) * 0.05,
        f'{prefix}_query_bias':   jax.random.normal(ks[3], (H,), jnp.float32) * 0.01,
        f'{prefix}_key_bias':     jax.random.normal(ks[4], (H,), jnp.float32) * 0.01,
        f'{prefix}_value_bias':   jax.random.normal(ks[5], (H,), jnp.float32) * 0.01,
    }

    hidden_states = jax.random.normal(ks[6], (B, S, H), jnp.float32)

    # BERT-style additive attention mask: [B, 1, 1, S], 0 for keep, -10000 for masked.
    keep = (jax.random.uniform(ks[7], (B, 1, 1, S)) > 0.2).astype(jnp.float32)
    attention_mask = (1.0 - keep) * -10000.0

    context_layer, attention_probs = bert_self_attention(
        params, prefix, hidden_states, attention_mask, nH, output_attentions=True)
    jax.block_until_ready((context_layer, attention_probs))

    # Lightweight correctness check against a pure-JAX f32 reference.
    # (Kernels use bf16 MXU inputs with f32 accumulation -> loose tolerance.)
    def ref(params, x, mask):
        def lin(w, b): return x @ w.T + b
        q = lin(params[f'{prefix}_query_weight'], params[f'{prefix}_query_bias'])
        k = lin(params[f'{prefix}_key_weight'], params[f'{prefix}_key_bias'])
        v = lin(params[f'{prefix}_value_weight'], params[f'{prefix}_value_bias'])
        def split(t): return t.reshape(B, S, nH, H // nH).transpose(0, 2, 1, 3)
        q, k, v = split(q), split(k), split(v)
        s = jnp.einsum('bhqd,bhkd->bhqk', q, k) / math.sqrt(H // nH) + mask
        p = jax.nn.softmax(s, axis=-1)
        c = jnp.einsum('bhqk,bhkd->bhqd', p, v)
        return c.transpose(0, 2, 1, 3).reshape(B, S, H), p

    ref_ctx, ref_probs = ref(params, hidden_states, attention_mask)
    assert context_layer.shape == (B, S, H)
    assert attention_probs.shape == (B, nH, S, S)
    assert jnp.allclose(context_layer, ref_ctx, atol=2e-2, rtol=2e-2), \
        float(jnp.max(jnp.abs(context_layer - ref_ctx)))
    assert jnp.allclose(attention_probs.astype(jnp.float32), ref_probs,
                        atol=1e-2, rtol=2e-2), \
        float(jnp.max(jnp.abs(attention_probs.astype(jnp.float32) - ref_probs)))

    # Also exercise the output_attentions=False (probs-free) kernel variant.
    (ctx_only,) = bert_self_attention(
        params, prefix, hidden_states, attention_mask, nH, output_attentions=False)
    jax.block_until_ready(ctx_only)
    assert jnp.allclose(ctx_only, ref_ctx, atol=2e-2, rtol=2e-2)

    print("KERNEL_OK")
</pallas_src>

<mosaic_0001>
module attributes {stable_mosaic.version = 11 : i64} {
  func.func @_qkv_linear_kernel(%arg0: i32, %arg1: memref<16x32xbf16, #tpu.memory_space<vmem>>, %arg2: memref<32x96xbf16, #tpu.memory_space<vmem>>, %arg3: memref<1x96xf32, #tpu.memory_space<vmem>>, %arg4: memref<16x32xbf16, #tpu.memory_space<vmem>>, %arg5: memref<16x32xbf16, #tpu.memory_space<vmem>>, %arg6: memref<16x32xbf16, #tpu.memory_space<vmem>>) attributes {dimension_semantics = [#tpu.dimension_semantics<parallel>], iteration_bounds = array<i64: 1>, scalar_prefetch = 0 : i64, scratch_operands = 0 : i64, tpu.core_type = #tpu.core_type<tc>, window_params = [{transform_indices = @transform_0, window_bounds = array<i64: 16, 32>}, {pipeline_mode = #tpu.pipeline_mode<synchronous>, transform_indices = @transform_1, window_bounds = array<i64: 32, 96>}, {pipeline_mode = #tpu.pipeline_mode<synchronous>, transform_indices = @transform_2, window_bounds = array<i64: 1, 96>}, {transform_indices = @transform_3, window_bounds = array<i64: 16, 32>}, {transform_indices = @transform_4, window_bounds = array<i64: 16, 32>}, {transform_indices = @transform_5, window_bounds = array<i64: 16, 32>}]} {
    %c0 = arith.constant 0 : index
    %c0_0 = arith.constant 0 : index
    %0 = vector.load %arg1[%c0, %c0_0] : memref<16x32xbf16, #tpu.memory_space<vmem>>, vector<16x32xbf16>
    %c0_1 = arith.constant 0 : index
    %c0_2 = arith.constant 0 : index
    %1 = vector.load %arg2[%c0_1, %c0_2] : memref<32x96xbf16, #tpu.memory_space<vmem>>, vector<32x96xbf16>
    %cst = arith.constant dense<0.000000e+00> : vector<16x96xf32>
    %2 = tpu.matmul %0, %1, %cst {dimension_numbers = #tpu.dot_dimension_numbers<[1], [0], [0], [1], [0, 0, 1, 1], [], []>} : vector<16x32xbf16>, vector<32x96xbf16>, vector<16x96xf32> -> vector<16x96xf32>
    %c0_3 = arith.constant 0 : index
    %c0_4 = arith.constant 0 : index
    %3 = vector.load %arg3[%c0_3, %c0_4] : memref<1x96xf32, #tpu.memory_space<vmem>>, vector<1x96xf32>
    %4 = vector.broadcast %3 : vector<1x96xf32> to vector<16x96xf32>
    %5 = arith.addf %2, %4 : vector<16x96xf32>
    %6 = vector.extract_strided_slice %5 {offsets = [0, 0], sizes = [16, 32], strides = [1, 1]} : vector<16x96xf32> to vector<16x32xf32>
    %cst_5 = arith.constant 0.353553385 : f32
    %7 = vector.broadcast %cst_5 : f32 to vector<16x32xf32>
    %8 = arith.mulf %6, %7 : vector<16x32xf32>
    %9 = arith.truncf %8 : vector<16x32xf32> to vector<16x32xbf16>
    %c0_6 = arith.constant 0 : index
    %c0_7 = arith.constant 0 : index
    %10 = vector.load %arg4[%c0_6, %c0_7] : memref<16x32xbf16, #tpu.memory_space<vmem>>, vector<16x32xbf16>
    tpu.vector_store %arg4[%c0_6, %c0_7], %9 {strides = array<i32>} : memref<16x32xbf16, #tpu.memory_space<vmem>>, vector<16x32xbf16>,
    %11 = vector.extract_strided_slice %5 {offsets = [0, 32], sizes = [16, 32], strides = [1, 1]} : vector<16x96xf32> to vector<16x32xf32>
    %12 = arith.truncf %11 : vector<16x32xf32> to vector<16x32xbf16>
    %c0_8 = arith.constant 0 : index
    %c0_9 = arith.constant 0 : index
    %13 = vector.load %arg5[%c0_8, %c0_9] : memref<16x32xbf16, #tpu.memory_space<vmem>>, vector<16x32xbf16>
    tpu.vector_store %arg5[%c0_8, %c0_9], %12 {strides = array<i32>} : memref<16x32xbf16, #tpu.memory_space<vmem>>, vector<16x32xbf16>,
    %14 = vector.extract_strided_slice %5 {offsets = [0, 64], sizes = [16, 32], strides = [1, 1]} : vector<16x96xf32> to vector<16x32xf32>
    %15 = arith.truncf %14 : vector<16x32xf32> to vector<16x32xbf16>
    %c0_10 = arith.constant 0 : index
    %c0_11 = arith.constant 0 : index
    %16 = vector.load %arg6[%c0_10, %c0_11] : memref<16x32xbf16, #tpu.memory_space<vmem>>, vector<16x32xbf16>
    tpu.vector_store %arg6[%c0_10, %c0_11], %15 {strides = array<i32>} : memref<16x32xbf16, #tpu.memory_space<vmem>>, vector<16x32xbf16>,
    return
  }
  func.func @transform_0(%arg0: i32) -> (i32, i32) {
    %c0_i32 = arith.constant 0 : i32
    %c0_i32_0 = arith.constant 0 : i32
    return %arg0, %c0_i32 : i32, i32
  }
  func.func @transform_1(%arg0: i32) -> (i32, i32) {
    %c0_i32 = arith.constant 0 : i32
    %c0_i32_0 = arith.constant 0 : i32
    %c0_i32_1 = arith.constant 0 : i32
    return %c0_i32, %c0_i32_0 : i32, i32
  }
  func.func @transform_2(%arg0: i32) -> (i32, i32) {
    %c0_i32 = arith.constant 0 : i32
    %c0_i32_0 = arith.constant 0 : i32
    %c0_i32_1 = arith.constant 0 : i32
    return %c0_i32, %c0_i32_0 : i32, i32
  }
  func.func @transform_3(%arg0: i32) -> (i32, i32) {
    %c0_i32 = arith.constant 0 : i32
    %c0_i32_0 = arith.constant 0 : i32
    return %arg0, %c0_i32 : i32, i32
  }
  func.func @transform_4(%arg0: i32) -> (i32, i32) {
    %c0_i32 = arith.constant 0 : i32
    %c0_i32_0 = arith.constant 0 : i32
    return %arg0, %c0_i32 : i32, i32
  }
  func.func @transform_5(%arg0: i32) -> (i32, i32) {
    %c0_i32 = arith.constant 0 : i32
    %c0_i32_0 = arith.constant 0 : i32
    return %arg0, %c0_i32 : i32, i32
  }
}

module attributes {stable_mosaic.version = 11 : i64} {
  func.func @_qkv_linear_kernel(%arg0: i32, %arg1: memref<16x32xbf16, #tpu.memory_space<vmem>>, %arg2: memref<32x96xbf16, #tpu.memory_space<vmem>>, %arg3: memref<1x96xf32, #tpu.memory_space<vmem>>, %arg4: memref<16x32xbf16, #tpu.memory_space<vmem>>, %arg5: memref<16x32xbf16, #tpu.memory_space<vmem>>, %arg6: memref<16x32xbf16, #tpu.memory_space<vmem>>) attributes {dimension_semantics = [#tpu.dimension_semantics<parallel>], iteration_bounds = array<i64: 1>, scalar_prefetch = 0 : i64, scratch_operands = 0 : i64, tpu.core_type = #tpu.core_type<tc>, window_params = [{transform_indices = @transform_0, window_bounds = array<i64: 16, 32>}, {pipeline_mode = #tpu.pipeline_mode<synchronous>, transform_indices = @transform_1, window_bounds = array<i64: 32, 96>}, {pipeline_mode = #tpu.pipeline_mode<synchronous>, transform_indices = @transform_2, window_bounds = array<i64: 1, 96>}, {transform_indices = @transform_3, window_bounds = array<i64: 16, 32>}, {transform_indices = @transform_4, window_bounds = array<i64: 16, 32>}, {transform_indices = @transform_5, window_bounds = array<i64: 16, 32>}]} {
    %c0 = arith.constant 0 : index
    %c0_0 = arith.constant 0 : index
    %0 = vector.load %arg1[%c0, %c0_0] : memref<16x32xbf16, #tpu.memory_space<vmem>>, vector<16x32xbf16>
    %c0_1 = arith.constant 0 : index
    %c0_2 = arith.constant 0 : index
    %1 = vector.load %arg2[%c0_1, %c0_2] : memref<32x96xbf16, #tpu.memory_space<vmem>>, vector<32x96xbf16>
    %cst = arith.constant dense<0.000000e+00> : vector<16x96xf32>
    %2 = tpu.matmul %0, %1, %cst {dimension_numbers = #tpu.dot_dimension_numbers<[1], [0], [0], [1], [0, 0, 1, 1], [], []>} : vector<16x32xbf16>, vector<32x96xbf16>, vector<16x96xf32> -> vector<16x96xf32>
    %c0_3 = arith.constant 0 : index
    %c0_4 = arith.constant 0 : index
    %3 = vector.load %arg3[%c0_3, %c0_4] : memref<1x96xf32, #tpu.memory_space<vmem>>, vector<1x96xf32>
    %4 = vector.broadcast %3 : vector<1x96xf32> to vector<16x96xf32>
    %5 = arith.addf %2, %4 : vector<16x96xf32>
    %6 = vector.extract_strided_slice %5 {offsets = [0, 0], sizes = [16, 32], strides = [1, 1]} : vector<16x96xf32> to vector<16x32xf32>
    %cst_5 = arith.constant 0.353553385 : f32
    %7 = vector.broadcast %cst_5 : f32 to vector<16x32xf32>
    %8 = arith.mulf %6, %7 : vector<16x32xf32>
    %9 = arith.truncf %8 : vector<16x32xf32> to vector<16x32xbf16>
    %c0_6 = arith.constant 0 : index
    %c0_7 = arith.constant 0 : index
    %10 = vector.load %arg4[%c0_6, %c0_7] : memref<16x32xbf16, #tpu.memory_space<vmem>>, vector<16x32xbf16>
    tpu.vector_store %arg4[%c0_6, %c0_7], %9 {strides = array<i32>} : memref<16x32xbf16, #tpu.memory_space<vmem>>, vector<16x32xbf16>,
    %11 = vector.extract_strided_slice %5 {offsets = [0, 32], sizes = [16, 32], strides = [1, 1]} : vector<16x96xf32> to vector<16x32xf32>
    %12 = arith.truncf %11 : vector<16x32xf32> to vector<16x32xbf16>
    %c0_8 = arith.constant 0 : index
    %c0_9 = arith.constant 0 : index
    %13 = vector.load %arg5[%c0_8, %c0_9] : memref<16x32xbf16, #tpu.memory_space<vmem>>, vector<16x32xbf16>
    tpu.vector_store %arg5[%c0_8, %c0_9], %12 {strides = array<i32>} : memref<16x32xbf16, #tpu.memory_space<vmem>>, vector<16x32xbf16>,
    %14 = vector.extract_strided_slice %5 {offsets = [0, 64], sizes = [16, 32], strides = [1, 1]} : vector<16x96xf32> to vector<16x32xf32>
    %15 = arith.truncf %14 : vector<16x32xf32> to vector<16x32xbf16>
    %c0_10 = arith.constant 0 : index
    %c0_11 = arith.constant 0 : index
    %16 = vector.load %arg6[%c0_10, %c0_11] : memref<16x32xbf16, #tpu.memory_space<vmem>>, vector<16x32xbf16>
    tpu.vector_store %arg6[%c0_10, %c0_11], %15 {strides = array<i32>} : memref<16x32xbf16, #tpu.memory_space<vmem>>, vector<16x32xbf16>,
    return
  }
  func.func @transform_0(%arg0: i32) -> (i32, i32) {
    %c0_i32 = arith.constant 0 : i32
    %c0_i32_0 = arith.constant 0 : i32
    return %arg0, %c0_i32 : i32, i32
  }
  func.func @transform_1(%arg0: i32) -> (i32, i32) {
    %c0_i32 = arith.constant 0 : i32
    %c0_i32_0 = arith.constant 0 : i32
    %c0_i32_1 = arith.constant 0 : i32
    return %c0_i32, %c0_i32_0 : i32, i32
  }
  func.func @transform_2(%arg0: i32) -> (i32, i32) {
    %c0_i32 = arith.constant 0 : i32
    %c0_i32_0 = arith.constant 0 : i32
    %c0_i32_1 = arith.constant 0 : i32
    return %c0_i32, %c0_i32_0 : i32, i32
  }
  func.func @transform_3(%arg0: i32) -> (i32, i32) {
    %c0_i32 = arith.constant 0 : i32
    %c0_i32_0 = arith.constant 0 : i32
    return %arg0, %c0_i32 : i32, i32
  }
  func.func @transform_4(%arg0: i32) -> (i32, i32) {
    %c0_i32 = arith.constant 0 : i32
    %c0_i32_0 = arith.constant 0 : i32
    return %arg0, %c0_i32 : i32, i32
  }
  func.func @transform_5(%arg0: i32) -> (i32, i32) {
    %c0_i32 = arith.constant 0 : i32
    %c0_i32_0 = arith.constant 0 : i32
    return %arg0, %c0_i32 : i32, i32
  }
}

</mosaic_0001>

<bundles_post_ra>
// kernel: tpu_custom_call.1
= control target key start
LH: loop header
LB: loop body
LE: loop exit
PB: predicated region body
PF: predicated region fallthrough
CT: control target
= control target key end

     0   :  { %11 = vsyncpa [#allocation3], 0  ;;  %s495_s0 = inlined_call_operand.hbm [shape: bf16[16,32], index: 0, kind: input, shape index: {}]   ;;  %s496_s1 = inlined_call_operand.hbm [shape: bf16[32,96], index: 1, kind: input, shape index: {}]   ;;  %s497_s2 = inlined_call_operand.vmem [shape: f32[1,96], index: 2, kind: input, shape index: {}]   ;;  %s498_s3 = inlined_call_operand.hbm [shape: bf16[16,32], index: 3, kind: output, shape index: {0}]   ;;  %s499_s4 = inlined_call_operand.hbm [shape: bf16[16,32], index: 4, kind: output, shape index: {1}]   ;;  %s500_s5 = inlined_call_operand.hbm [shape: bf16[16,32], index: 5, kind: output, shape index: {2}]  }
   0x1   :  { %12 = vsyncpa [#allocation6], 0 }
   0x2   :  { %13 = vsyncpa [#allocation4], 0 }
   0x3   :  { %14 = vsyncpa [#allocation9], 0  ;;  %s362_s18 = smov [#allocation2]   ;;  %s244_s22 = scalar_lea.hbm %s495_s0, 128 }
   0x4   :  { %s20_s19 = sshll.u32 %s362_s18, 4  ;;  %p245_p0 = scmp.ne.s32.totalorder %s495_s0, %s244_s22  ;;  %s21_s19 = int_to_ptr.vmem [resolvable:$true] %s20_s19 }
   0x5   :  { %p248_p1 = scmp.lt.u32.totalorder %s244_s22, %s495_s0 }
   0x7   :  { %p250_p2 = pnand %p248_p1, %p245_p0 }
   0x9   :  { %253 = shalt.err (!%p250_p2)
}
   0xa   :  { %s254_s27 = scalar_lea.vmem %s21_s19, 128  ;;  %p259_p4 = scmp.lt.s32.totalorder %s21_s19, %s21_s19 }
   0xb   :  { %p255_p3 = scmp.ne.s32.totalorder %s21_s19, %s254_s27  ;;  %p260_p5 = scmp.lt.s32.totalorder %s254_s27, %s254_s27 }
   0xd   :  { %p261_p6 = por %p260_p5, %p259_p4 }
   0xf   :  { %p262_p7 = pnand %p261_p6, %p255_p3 }
  0x11   :  { %265 = shalt.err (!%p262_p7)
}
  0x12   :  { %s363_s28 = smov 64   ;;  %s364_s29 = smov 4  }
  0x13   :  { %26 = dma.hbm_to_vmem [thread:$0]  %s495_s0, 128, %s21_s19, [#allocation3], %s363_s28, %s363_s28, %s364_s29  }
  0x14   :  { %s365_s7 = smov [#allocation5]   ;;  %s266_s11 = scalar_lea.hbm %s496_s1, 256 }
  0x15   :  { %s32_s8 = sshll.u32 %s365_s7, 4  ;;  %p267_p8 = scmp.ne.s32.totalorder %s496_s1, %s266_s11  ;;  %s33_s8 = int_to_ptr.vmem [resolvable:$true] %s32_s8 }
  0x16   :  { %p270_p9 = scmp.lt.u32.totalorder %s266_s11, %s496_s1 }
  0x18   :  { %p272_p10 = pnand %p270_p9, %p267_p8 }
  0x1a   :  { %275 = shalt.err (!%p272_p10)
}
  0x1b   :  { %s276_s16 = scalar_lea.vmem %s33_s8, 256  ;;  %p281_p12 = scmp.lt.s32.totalorder %s33_s8, %s33_s8 }
  0x1c   :  { %p277_p11 = scmp.ne.s32.totalorder %s33_s8, %s276_s16  ;;  %p282_p13 = scmp.lt.s32.totalorder %s276_s16, %s276_s16 }
  0x1e   :  { %p283_p0 = por %p282_p13, %p281_p12 }
  0x20   :  { %p284_p1 = pnand %p283_p0, %p277_p11 }
  0x22   :  { %287 = shalt.err (!%p284_p1)
}
  0x23   :  { %38 = dma.hbm_to_vmem [thread:$0]  %s496_s1, 256, %s33_s8, [#allocation6], %s363_s28, %s363_s28, %s364_s29  }
  0x24   :  { %354 = dma.done.wait [#allocation3], 128  }
  0x25   :  { %355 = vsyncadd [#allocation3], 4294967168 }
  0x26   :  { %356 = dma.done.wait [#allocation6], 256  }
  0x27   :  { %357 = vsyncadd [#allocation6], 4294967040  ;;  %v366_v0 = vmov 0.0   ;;  %vm367_vm0 = vmmov 0   ;;  %v241_v1 = vld [vmem:[#allocation5] sm:$0xff]   ;;  %v242_v2 = vld [vmem:[#allocation5 + $0x8] sm:$0xff]  }
  0x28   :  { %223 = vmatprep.subr.bf16.mxu0 %v366_v0  ;;  %227 = vmatprep.mubr.msk.bf16.mxu0 %vm367_vm0, %v366_v0  ;;  %v243_v3 = vld [vmem:[#allocation2] sm:$0xff]   ;;  %vm78_vm1 = vcmask 261120   ;;  %vm133_vm2 = vcmask 257024   ;;  %s368_s1 = smov [#allocation7]   ;;  %s369_s21 = smov 96  }
  0x29   :  { %224 = vmatpush3.bf16.msra.mxu0 %v241_v1  ;;  %v207_v4 = vld [vmem:[%s497_s2] ss:$0 sm:$0xff]  ;;  %s163_s20 = sshll.u32 %s368_s1, 4  ;;  %s164_s20 = int_to_ptr.vmem [resolvable:$true] %s163_s20 }
  0x2a   :  { %225 = vmatprep.subr.bf16.mxu0 %v366_v0  ;;  %s288_s2 = scalar_lea.vmem %s164_s20, 128  ;;  %p293_p3 = scmp.lt.s32.totalorder %s164_s20, %s164_s20 }
  0x2b   :  { %p289_p2 = scmp.ne.s32.totalorder %s164_s20, %s288_s2  ;;  %p294_p4 = scmp.lt.s32.totalorder %s288_s2, %s288_s2 }
  0x2d   :  { %226 = vmatpush3.bf16.msra.mxu0 %v242_v2  ;;  %p295_p5 = por %p294_p4, %p293_p3 }
  0x2f   :  { %p296_p6 = pnand %p295_p5, %p289_p2 }
  0x30   :  { %228 = vmatmul.mubr.msk.bf16.vlgmr.msra.gmra.mrb[0].mxu0 %vm78_vm1, %v243_v3 }
 0x103   :  { %v116_v5 = vpop.f32.mrb[0].mxu0 }
 0x104   :  { %v117_v6 = vadd.f32 %v207_v4, %v116_v5  ;;  %v229_v7 = vpop.f32.mrb[1].mxu0 }
 0x105   :  { %v119_v8 = vpop.f32.mrb[2].mxu0 }
 0x106   :  { %v123_v9 = vmul.f32 0.35355338, %v117_v6  ;;  %v120_v10 = vadd.f32 %v207_v4, %v119_v8  ;;  %v230_v11 = vpop.f32.mrb[3].mxu0  ;;  %v218_v12 = vpack.c.bf16 %v117_v6, %v117_v6 }
 0x108   :  { %v216_v13 = vpack.c.bf16 %v123_v9, %v123_v9  ;;  %v124_v14 = vmul.f32 0.35355338, %v120_v10  ;;  %150 = vrot.lane.b32.xlu1 %v218_v12, %s363_s28  ;;  %142 = vrot.lane.b32.xlu0 %v218_v12, %s369_s21  ;;  %v219_v16 = vpack.c.bf16 %v120_v10, %v120_v10 }
 0x10a   :  { %v217_v15 = vpack.c.bf16 %v124_v14, %v124_v14  ;;  %134 = vst.msk [vmem:[#allocation7] sm:$0xf] %vm133_vm2, %v216_v13 }
 0x10c   :  { %152 = vrot.lane.b32.xlu1 %v219_v16, %s363_s28  ;;  %144 = vrot.lane.b32.xlu0 %v219_v16, %s369_s21  ;;  %135 = vst.msk [vmem:[#allocation7 + $0x4] sm:$0xf] %vm133_vm2, %v217_v15 }
 0x10d   :  { %299 = shalt.err (!%p296_p6)
}
 0x10e   :  { %s300_s24 = scalar_lea.hbm %s498_s3, 128 }
 0x10f   :  { %p301_p7 = scmp.ne.s32.totalorder %s498_s3, %s300_s24  ;;  %p304_p8 = scmp.lt.u32.totalorder %s300_s24, %s498_s3 }
 0x111   :  { %p306_p9 = pnand %p304_p8, %p301_p7 }
 0x113   :  { %309 = shalt.err (!%p306_p9)
}
 0x114   :  { %169 = dma.vmem_to_hbm [thread:$0]  %s164_s20, 128, %s498_s3, [#allocation4], %s363_s28, %s363_s28, %s364_s29  }
 0x115   :  { %s370_s8 = smov [#allocation8]   ;;  %s371_s10 = smov [#allocation10]  }
 0x116   :  { %s175_s9 = sshll.u32 %s370_s8, 4  ;;  %s187_s11 = sshll.u32 %s371_s10, 4  ;;  %s176_s9 = int_to_ptr.vmem [resolvable:$true] %s175_s9  ;;  %s456_s11 = int_to_ptr.vmem [resolvable:$true] %s187_s11 }
 0x117   :  { %s310_s3 = scalar_lea.vmem %s176_s9, 128  ;;  %p315_p11 = scmp.lt.s32.totalorder %s176_s9, %s176_s9 }
 0x118   :  { %p311_p10 = scmp.ne.s32.totalorder %s176_s9, %s310_s3  ;;  %p316_p12 = scmp.lt.s32.totalorder %s310_s3, %s310_s3 }
 0x11a   :  { %p317_p13 = por %p316_p12, %p315_p11 }
 0x11c   :  { %p318_p0 = pnand %p317_p13, %p311_p10 }
 0x17a   :  { %v151_v17 = vpop.permute.xlu1 %150  ;;  %v143_v18 = vpop.permute.xlu0 %142 }
 0x17b   :  { %156 = vst.msk [vmem:[#allocation10] sm:$0xf] %vm133_vm2, %v151_v17  ;;  %148 = vst.msk [vmem:[#allocation8] sm:$0xf] %vm133_vm2, %v143_v18 }
 0x17e   :  { %v153_v19 = vpop.permute.xlu1 %152  ;;  %v145_v20 = vpop.permute.xlu0 %144 }
 0x17f   :  { %157 = vst.msk [vmem:[#allocation10 + $0x4] sm:$0xf] %vm133_vm2, %v153_v19  ;;  %149 = vst.msk [vmem:[#allocation8 + $0x4] sm:$0xf] %vm133_vm2, %v145_v20 }
 0x180   :  { %321 = shalt.err (!%p318_p0)
}
 0x181   :  { %s322_s14 = scalar_lea.hbm %s499_s4, 128 }
 0x182   :  { %p323_p1 = scmp.ne.s32.totalorder %s499_s4, %s322_s14  ;;  %p326_p2 = scmp.lt.u32.totalorder %s322_s14, %s499_s4 }
 0x184   :  { %p328_p3 = pnand %p326_p2, %p323_p1 }
 0x186   :  { %331 = shalt.err (!%p328_p3)
}
 0x187   :  { %181 = dma.vmem_to_hbm [thread:$0]  %s176_s9, 128, %s499_s4, [#allocation9], %s363_s28, %s363_s28, %s364_s29  }
 0x188   :  { %s332_s1 = scalar_lea.vmem %s456_s11, 128  ;;  %p337_p5 = scmp.lt.s32.totalorder %s456_s11, %s456_s11 }
 0x189   :  { %p333_p4 = scmp.ne.s32.totalorder %s456_s11, %s332_s1  ;;  %p338_p6 = scmp.lt.s32.totalorder %s332_s1, %s332_s1 }
 0x18b   :  { %p339_p7 = por %p338_p6, %p337_p5 }
 0x18d   :  { %p340_p8 = pnand %p339_p7, %p333_p4 }
 0x18f   :  { %343 = shalt.err (!%p340_p8)
}
 0x190   :  { %s344_s2 = scalar_lea.hbm %s500_s5, 128 }
 0x191   :  { %p345_p9 = scmp.ne.s32.totalorder %s500_s5, %s344_s2  ;;  %p348_p10 = scmp.lt.u32.totalorder %s344_s2, %s500_s5 }
 0x193   :  { %p350_p11 = pnand %p348_p10, %p345_p9 }
 0x195   :  { %353 = shalt.err (!%p350_p11)
}
 0x196   :  { %193 = dma.vmem_to_hbm [thread:$0]  %s456_s11, 128, %s500_s5, [#allocation9], %s363_s28, %s363_s28, %s364_s29  }
 0x197   :  { %358 = dma.done.wait [#allocation4], 128  }
 0x198   :  { %359 = vsyncadd [#allocation4], 4294967168 }
 0x199   :  { %360 = dma.done.wait [#allocation9], 256  }
 0x19a   :  { %361 = vsyncadd [#allocation9], 4294967040 }
 0x19b   :  { %203 = vsyncpa [#allocation3], 1 }
 0x19c   :  { %204 = vsyncpa [#allocation6], 1 }
 0x19d   :  { %205 = vsyncpa [#allocation4], 1 }
 0x19e   :  { %206 = vsyncpa [#allocation9], 1 }

// kernel: tpu_custom_call.1
= control target key start
LH: loop header
LB: loop body
LE: loop exit
PB: predicated region body
PF: predicated region fallthrough
CT: control target
= control target key end

     0   :  { %11 = vsyncpa [#allocation3], 0  ;;  %s495_s0 = inlined_call_operand.hbm [shape: bf16[16,32], index: 0, kind: input, shape index: {}]   ;;  %s496_s1 = inlined_call_operand.hbm [shape: bf16[32,96], index: 1, kind: input, shape index: {}]   ;;  %s497_s2 = inlined_call_operand.vmem [shape: f32[1,96], index: 2, kind: input, shape index: {}]   ;;  %s498_s3 = inlined_call_operand.hbm [shape: bf16[16,32], index: 3, kind: output, shape index: {0}]   ;;  %s499_s4 = inlined_call_operand.hbm [shape: bf16[16,32], index: 4, kind: output, shape index: {1}]   ;;  %s500_s5 = inlined_call_operand.hbm [shape: bf16[16,32], index: 5, kind: output, shape index: {2}]  }
   0x1   :  { %12 = vsyncpa [#allocation6], 0 }
   0x2   :  { %13 = vsyncpa [#allocation4], 0 }
   0x3   :  { %14 = vsyncpa [#allocation9], 0  ;;  %s362_s18 = smov [#allocation2]   ;;  %s244_s22 = scalar_lea.hbm %s495_s0, 128 }
   0x4   :  { %s20_s19 = sshll.u32 %s362_s18, 4  ;;  %p245_p0 = scmp.ne.s32.totalorder %s495_s0, %s244_s22  ;;  %s21_s19 = int_to_ptr.vmem [resolvable:$true] %s20_s19 }
   0x5   :  { %p248_p1 = scmp.lt.u32.totalorder %s244_s22, %s495_s0 }
   0x7   :  { %p250_p2 = pnand %p248_p1, %p245_p0 }
   0x9   :  { %253 = shalt.err (!%p250_p2)
}
   0xa   :  { %s254_s27 = scalar_lea.vmem %s21_s19, 128  ;;  %p259_p4 = scmp.lt.s32.totalorder %s21_s19, %s21_s19 }
   0xb   :  { %p255_p3 = scmp.ne.s32.totalorder %s21_s19, %s254_s27  ;;  %p260_p5 = scmp.lt.s32.totalorder %s254_s27, %s254_s27 }
   0xd   :  { %p261_p6 = por %p260_p5, %p259_p4 }
   0xf   :  { %p262_p7 = pnand %p261_p6, %p255_p3 }
  0x11   :  { %265 = shalt.err (!%p262_p7)
}
  0x12   :  { %s363_s28 = smov 64   ;;  %s364_s29 = smov 4  }
  0x13   :  { %26 = dma.hbm_to_vmem [thread:$0]  %s495_s0, 128, %s21_s19, [#allocation3], %s363_s28, %s363_s28, %s364_s29  }
  0x14   :  { %s365_s7 = smov [#allocation5]   ;;  %s266_s11 = scalar_lea.hbm %s496_s1, 256 }
  0x15   :  { %s32_s8 = sshll.u32 %s365_s7, 4  ;;  %p267_p8 = scmp.ne.s32.totalorder %s496_s1, %s266_s11  ;;  %s33_s8 = int_to_ptr.vmem [resolvable:$true] %s32_s8 }
  0x16   :  { %p270_p9 = scmp.lt.u32.totalorder %s266_s11, %s496_s1 }
  0x18   :  { %p272_p10 = pnand %p270_p9, %p267_p8 }
  0x1a   :  { %275 = shalt.err (!%p272_p10)
}
  0x1b   :  { %s276_s16 = scalar_lea.vmem %s33_s8, 256  ;;  %p281_p12 = scmp.lt.s32.totalorder %s33_s8, %s33_s8 }
  0x1c   :  { %p277_p11 = scmp.ne.s32.totalorder %s33_s8, %s276_s16  ;;  %p282_p13 = scmp.lt.s32.totalorder %s276_s16, %s276_s16 }
  0x1e   :  { %p283_p0 = por %p282_p13, %p281_p12 }
  0x20   :  { %p284_p1 = pnand %p283_p0, %p277_p11 }
  0x22   :  { %287 = shalt.err (!%p284_p1)
}
  0x23   :  { %38 = dma.hbm_to_vmem [thread:$0]  %s496_s1, 256, %s33_s8, [#allocation6], %s363_s28, %s363_s28, %s364_s29  }
  0x24   :  { %354 = dma.done.wait [#allocation3], 128  }
  0x25   :  { %355 = vsyncadd [#allocation3], 4294967168 }
  0x26   :  { %356 = dma.done.wait [#allocation6], 256  }
  0x27   :  { %357 = vsyncadd [#allocation6], 4294967040  ;;  %v366_v0 = vmov 0.0   ;;  %vm367_vm0 = vmmov 0   ;;  %v241_v1 = vld [vmem:[#allocation5] sm:$0xff]   ;;  %v242_v2 = vld [vmem:[#allocation5 + $0x8] sm:$0xff]  }
  0x28   :  { %223 = vmatprep.subr.bf16.mxu0 %v366_v0  ;;  %227 = vmatprep.mubr.msk.bf16.mxu0 %vm367_vm0, %v366_v0  ;;  %v243_v3 = vld [vmem:[#allocation2] sm:$0xff]   ;;  %vm78_vm1 = vcmask 261120   ;;  %vm133_vm2 = vcmask 257024   ;;  %s368_s1 = smov [#allocation7]   ;;  %s369_s21 = smov 96  }
  0x29   :  { %224 = vmatpush3.bf16.msra.mxu0 %v241_v1  ;;  %v207_v4 = vld [vmem:[%s497_s2] ss:$0 sm:$0xff]  ;;  %s163_s20 = sshll.u32 %s368_s1, 4  ;;  %s164_s20 = int_to_ptr.vmem [resolvable:$true] %s163_s20 }
  0x2a   :  { %225 = vmatprep.subr.bf16.mxu0 %v366_v0  ;;  %s288_s2 = scalar_lea.vmem %s164_s20, 128  ;;  %p293_p3 = scmp.lt.s32.totalorder %s164_s20, %s164_s20 }
  0x2b   :  { %p289_p2 = scmp.ne.s32.totalorder %s164_s20, %s288_s2  ;;  %p294_p4 = scmp.lt.s32.totalorder %s288_s2, %s288_s2 }
  0x2d   :  { %226 = vmatpush3.bf16.msra.mxu0 %v242_v2  ;;  %p295_p5 = por %p294_p4, %p293_p3 }
  0x2f   :  { %p296_p6 = pnand %p295_p5, %p289_p2 }
  0x30   :  { %228 = vmatmul.mubr.msk.bf16.vlgmr.msra.gmra.mrb[0].mxu0 %vm78_vm1, %v243_v3 }
 0x103   :  { %v116_v5 = vpop.f32.mrb[0].mxu0 }
 0x104   :  { %v117_v6 = vadd.f32 %v207_v4, %v116_v5  ;;  %v229_v7 = vpop.f32.mrb[1].mxu0 }
 0x105   :  { %v119_v8 = vpop.f32.mrb[2].mxu0 }
 0x106   :  { %v123_v9 = vmul.f32 0.35355338, %v117_v6  ;;  %v120_v10 = vadd.f32 %v207_v4, %v119_v8  ;;  %v230_v11 = vpop.f32.mrb[3].mxu0  ;;  %v218_v12 = vpack.c.bf16 %v117_v6, %v117_v6 }
 0x108   :  { %v216_v13 = vpack.c.bf16 %v123_v9, %v123_v9  ;;  %v124_v14 = vmul.f32 0.35355338, %v120_v10  ;;  %150 = vrot.lane.b32.xlu1 %v218_v12, %s363_s28  ;;  %142 = vrot.lane.b32.xlu0 %v218_v12, %s369_s21  ;;  %v219_v16 = vpack.c.bf16 %v120_v10, %v120_v10 }
 0x10a   :  { %v217_v15 = vpack.c.bf16 %v124_v14, %v124_v14  ;;  %134 = vst.msk [vmem:[#allocation7] sm:$0xf] %vm133_vm2, %v216_v13 }
 0x10c   :  { %152 = vrot.lane.b32.xlu1 %v219_v16, %s363_s28  ;;  %144 = vrot.lane.b32.xlu0 %v219_v16, %s369_s21  ;;  %135 = vst.msk [vmem:[#allocation7 + $0x4] sm:$0xf] %vm133_vm2, %v217_v15 }
 0x10d   :  { %299 = shalt.err (!%p296_p6)
}
 0x10e   :  { %s300_s24 = scalar_lea.hbm %s498_s3, 128 }
 0x10f   :  { %p301_p7 = scmp.ne.s32.totalorder %s498_s3, %s300_s24  ;;  %p304_p8 = scmp.lt.u32.totalorder %s300_s24, %s498_s3 }
 0x111   :  { %p306_p9 = pnand %p304_p8, %p301_p7 }
 0x113   :  { %309 = shalt.err (!%p306_p9)
}
 0x114   :  { %169 = dma.vmem_to_hbm [thread:$0]  %s164_s20, 128, %s498_s3, [#allocation4], %s363_s28, %s363_s28, %s364_s29  }
 0x115   :  { %s370_s8 = smov [#allocation8]   ;;  %s371_s10 = smov [#allocation10]  }
 0x116   :  { %s175_s9 = sshll.u32 %s370_s8, 4  ;;  %s187_s11 = sshll.u32 %s371_s10, 4  ;;  %s176_s9 = int_to_ptr.vmem [resolvable:$true] %s175_s9  ;;  %s456_s11 = int_to_ptr.vmem [resolvable:$true] %s187_s11 }
 0x117   :  { %s310_s3 = scalar_lea.vmem %s176_s9, 128  ;;  %p315_p11 = scmp.lt.s32.totalorder %s176_s9, %s176_s9 }
 0x118   :  { %p311_p10 = scmp.ne.s32.totalorder %s176_s9, %s310_s3  ;;  %p316_p12 = scmp.lt.s32.totalorder %s310_s3, %s310_s3 }
 0x11a   :  { %p317_p13 = por %p316_p12, %p315_p11 }
 0x11c   :  { %p318_p0 = pnand %p317_p13, %p311_p10 }
 0x17a   :  { %v151_v17 = vpop.permute.xlu1 %150  ;;  %v143_v18 = vpop.permute.xlu0 %142 }
 0x17b   :  { %156 = vst.msk [vmem:[#allocation10] sm:$0xf] %vm133_vm2, %v151_v17  ;;  %148 = vst.msk [vmem:[#allocation8] sm:$0xf] %vm133_vm2, %v143_v18 }
 0x17e   :  { %v153_v19 = vpop.permute.xlu1 %152  ;;  %v145_v20 = vpop.permute.xlu0 %144 }
 0x17f   :  { %157 = vst.msk [vmem:[#allocation10 + $0x4] sm:$0xf] %vm133_vm2, %v153_v19  ;;  %149 = vst.msk [vmem:[#allocation8 + $0x4] sm:$0xf] %vm133_vm2, %v145_v20 }
 0x180   :  { %321 = shalt.err (!%p318_p0)
}
 0x181   :  { %s322_s14 = scalar_lea.hbm %s499_s4, 128 }
 0x182   :  { %p323_p1 = scmp.ne.s32.totalorder %s499_s4, %s322_s14  ;;  %p326_p2 = scmp.lt.u32.totalorder %s322_s14, %s499_s4 }
 0x184   :  { %p328_p3 = pnand %p326_p2, %p323_p1 }
 0x186   :  { %331 = shalt.err (!%p328_p3)
}
 0x187   :  { %181 = dma.vmem_to_hbm [thread:$0]  %s176_s9, 128, %s499_s4, [#allocation9], %s363_s28, %s363_s28, %s364_s29  }
 0x188   :  { %s332_s1 = scalar_lea.vmem %s456_s11, 128  ;;  %p337_p5 = scmp.lt.s32.totalorder %s456_s11, %s456_s11 }
 0x189   :  { %p333_p4 = scmp.ne.s32.totalorder %s456_s11, %s332_s1  ;;  %p338_p6 = scmp.lt.s32.totalorder %s332_s1, %s332_s1 }
 0x18b   :  { %p339_p7 = por %p338_p6, %p337_p5 }
 0x18d   :  { %p340_p8 = pnand %p339_p7, %p333_p4 }
 0x18f   :  { %343 = shalt.err (!%p340_p8)
}
 0x190   :  { %s344_s2 = scalar_lea.hbm %s500_s5, 128 }
 0x191   :  { %p345_p9 = scmp.ne.s32.totalorder %s500_s5, %s344_s2  ;;  %p348_p10 = scmp.lt.u32.totalorder %s344_s2, %s500_s5 }
 0x193   :  { %p350_p11 = pnand %p348_p10, %p345_p9 }
 0x195   :  { %353 = shalt.err (!%p350_p11)
}
 0x196   :  { %193 = dma.vmem_to_hbm [thread:$0]  %s456_s11, 128, %s500_s5, [#allocation9], %s363_s28, %s363_s28, %s364_s29  }
 0x197   :  { %358 = dma.done.wait [#allocation4], 128  }
 0x198   :  { %359 = vsyncadd [#allocation4], 4294967168 }
 0x199   :  { %360 = dma.done.wait [#allocation9], 256  }
 0x19a   :  { %361 = vsyncadd [#allocation9], 4294967040 }
 0x19b   :  { %203 = vsyncpa [#allocation3], 1 }
 0x19c   :  { %204 = vsyncpa [#allocation6], 1 }
 0x19d   :  { %205 = vsyncpa [#allocation4], 1 }
 0x19e   :  { %206 = vsyncpa [#allocation9], 1 }

</bundles_post_ra>
